<compile_context>
chip_gen: v7x
topology: tpu7x:2x2x1
jax: 0.10.0
libtpu: 0.0.40
codegen_flags: <defaults>
</compile_context>

<pallas_src>
from functools import partial

import numpy as np
import jax
import jax.numpy as jnp
from jax import lax
from jax.experimental import pallas as pl
from jax.experimental.pallas import tpu as pltpu


_LANE_CHUNK = 512        # in-kernel register-blocking chunk (4 vregs wide)
_MAX_LANE_TILE = 32768   # lane-tile cap per grid step


def _round_up(n, m):
    return ((n + m - 1) // m) * m


def _choose_lane_tile(n_pad, n_ctrl_rows):
    """Largest multiple-of-_LANE_CHUNK divisor of n_pad (capped); keep >=2 grid steps."""
    def largest_divisor(cap):
        t = min(n_pad, max(cap, _LANE_CHUNK))
        t -= t % _LANE_CHUNK
        while n_pad % t:
            t -= _LANE_CHUNK
        return t

    tn = largest_divisor(_MAX_LANE_TILE)
    # v7x megacore: if the problem collapsed to one grid step, split the lane
    # axis so both TensorCores get work.
    if n_ctrl_rows * (n_pad // tn) < 2 and n_pad >= 2 * _LANE_CHUNK:
        tn = largest_divisor(n_pad // 2)
    return tn


# ----------------------------- Pallas kernel (hot path) -----------------------------

def _cu_rows_kernel(w_ref, x_ref, y_ref):
    """Apply complex M_exp (dim x dim) to one controlled slab of the state.

    w_ref: (2, dim, dim) f32   plane 0 = Re(M_exp), plane 1 = Im(M_exp)
    x_ref: (2, dim, tn)  f32   plane 0 = Re(x),     plane 1 = Im(x)
    y_ref: (2, dim, tn)  f32
    """
    dim = w_ref.shape[1]
    tn = x_ref.shape[-1]
    wr = w_ref[0]                     # (dim, dim), loop-invariant
    wi = w_ref[1]
    n_chunks = tn // _LANE_CHUNK

    def body(s, carry):
        off = pl.multiple_of(s * _LANE_CHUNK, _LANE_CHUNK)
        sl = pl.ds(off, _LANE_CHUNK)
        xr = x_ref[0, :, sl]          # (dim, chunk)
        xi = x_ref[1, :, sl]
        yr = jnp.zeros_like(xr)
        yi = jnp.zeros_like(xi)
        # Tiny contraction (length dim): VPU broadcast-MACs, no MXU.
        for j in range(dim):
            wr_c = wr[:, j:j + 1]     # (dim, 1) -> broadcast along lanes
            wi_c = wi[:, j:j + 1]
            xr_j = xr[j:j + 1, :]     # (1, chunk) -> broadcast along sublanes
            xi_j = xi[j:j + 1, :]
            yr = yr + wr_c * xr_j - wi_c * xi_j
            yi = yi + wr_c * xi_j + wi_c * xr_j
        y_ref[0, :, sl] = yr
        y_ref[1, :, sl] = yi
        return carry

    lax.fori_loop(0, n_chunks, body, 0)


def _pallas_apply_ctrl(w, xp, *, dim, n_ctrl, n_lanes):
    """xp: (2, n_ctrl, dim, n_lanes) f32 -> same-shape output (M_exp applied per slab)."""
    tn = _choose_lane_tile(n_lanes, n_ctrl)
    grid = (n_ctrl, n_lanes // tn)

    w_spec = pl.BlockSpec((2, dim, dim), lambda c, j: (0, 0, 0))
    x_spec = pl.BlockSpec((2, None, dim, tn), lambda c, j: (0, c, 0, j))

    cost = pl.CostEstimate(
        flops=8 * dim * dim * n_ctrl * n_lanes,
        transcendentals=0,
        bytes_accessed=16 * dim * n_ctrl * n_lanes + 8 * dim * dim,
    )

    return pl.pallas_call(
        _cu_rows_kernel,
        out_shape=jax.ShapeDtypeStruct((2, n_ctrl, dim, n_lanes), jnp.float32),
        grid=grid,
        in_specs=[w_spec, x_spec],
        out_specs=x_spec,
        compiler_params=pltpu.CompilerParams(
            dimension_semantics=("parallel", "parallel"),
            vmem_limit_bytes=32 * 1024 * 1024,
        ),
        cost_estimate=cost,
    )(w, xp)


# ----------------------------- jitted forward (plumbing + kernel) -----------------------------

@partial(jax.jit, static_argnames=("dim", "wires", "control", "target", "control_state"))
def _cu_apply(w, x, *, dim, wires, control, target, control_state):
    D, B = x.shape
    x = x.astype(jnp.complex64)
    rest = tuple(i for i in range(wires) if i not in (control, target))
    N = (D // (dim * dim)) * B
    C = len(control_state)

    needs_perm = (control, target) != (0, 1)
    x_nd = x.reshape((dim,) * wires + (B,))
    if needs_perm:
        perm = (control, target) + rest + (wires,)
        inv_perm = tuple(int(p) for p in np.argsort(perm))
        x_nd = jnp.transpose(x_nd, perm)           # one complex transpose (only if needed)
    x3 = x_nd.reshape(dim, dim, N)                 # (control, target, rest*batch)

    # Gather only the controlled slabs (static indices) and split re/im once.
    xg = jnp.stack([x3[d] for d in control_state], axis=0)     # (C, dim, N) complex64
    xp = jnp.stack([jnp.real(xg), jnp.imag(xg)], axis=0)       # (2, C, dim, N) f32

    # Lane padding to a multiple of the in-kernel chunk (never a giant single block).
    N_pad = _round_up(N, _LANE_CHUNK)
    if N_pad != N:
        xp = jnp.pad(xp, ((0, 0), (0, 0), (0, 0), (0, N_pad - N)))

    yp = _pallas_apply_ctrl(w, xp, dim=dim, n_ctrl=C, n_lanes=N_pad)
    if N_pad != N:
        yp = yp[..., :N]

    # Stitch the transformed slabs back; untouched control values pass straight through.
    pos = {d: i for i, d in enumerate(control_state)}
    pieces = []
    for d in range(dim):
        if d in pos:
            c = pos[d]
            pieces.append(lax.complex(yp[0, c], yp[1, c])[None])
        else:
            pieces.append(x3[d][None])
    y3 = jnp.concatenate(pieces, axis=0)                        # (dim, dim, N) complex64

    y_nd = y3.reshape((dim, dim) + (dim,) * len(rest) + (B,))
    if needs_perm:
        y_nd = jnp.transpose(y_nd, inv_perm)
    return y_nd.reshape(D, B)


# ----------------------------- CU module equivalent -----------------------------

class CUGate:
    """JAX/Pallas equivalent of quforge.CU (controlled-U on qudits)."""

    def __init__(self, dim=2, wires=2, index=(0, 1), control_state=(1,), key=None):
        self.dim = dim
        self.wires = wires
        self.index = tuple(int(i) for i in index)
        self.control_state = tuple(int(d) for d in control_state)
        if key is None:
            key = jax.random.PRNGKey(0)
        kr, ki = jax.random.split(key)
        M = (jnp.eye(dim, dtype=jnp.float32)
             + jax.random.normal(kr, (dim, dim), dtype=jnp.float32)
             + 1j * jax.random.normal(ki, (dim, dim), dtype=jnp.float32))
        self.M = M.astype(jnp.complex64)   # the nn.Parameter in the torch module
        self._w_cache = None
        self._w_cache_src = None

    def _mexp_planes(self):
        # matrix_exp(M - M^H) of the tiny dim x dim generator, computed once on
        # the host (eigh of the Hermitian i*(M - M^H) reproduces torch.matrix_exp
        # here) and cached -> no per-call host sync / re-upload.
        if self._w_cache is None or self._w_cache_src is not self.M:
            M = np.asarray(self.M).astype(np.complex128)
            A = M - M.conj().T
            evals, V = np.linalg.eigh(1j * A)
            M_exp = (V * np.exp(-1j * evals)[None, :]) @ V.conj().T   # = expm(A)
            w = np.stack([M_exp.real, M_exp.imag]).astype(np.float32)
            self._w_cache = jnp.asarray(w)          # (2, dim, dim) f32
            self._w_cache_src = self.M
        return self._w_cache

    def __call__(self, x):
        control, target = self.index
        cs = tuple(sorted(set(d for d in self.control_state if 0 <= d < self.dim)))
        # Degenerate cases where the whole gate is exactly the identity.
        if not cs or control == target:
            return x.astype(jnp.complex64)
        return _cu_apply(
            self._mexp_planes(), x,
            dim=self.dim, wires=self.wires,
            control=control, target=target, control_state=cs,
        )


# ----------------------------- pure numpy reference (mirrors torch forward) -----------------------------

def reference_forward(M_param, dim, wires, index, control_state, x):
    M = np.asarray(M_param).astype(np.complex128)
    A = M - M.conj().T
    evals, V = np.linalg.eigh(1j * A)
    M_exp = (V * np.exp(-1j * evals)[None, :]) @ V.conj().T   # matrix_exp(M - M^H)
    basis = np.eye(dim, dtype=np.complex128)
    U = np.zeros((dim ** wires, dim ** wires), dtype=np.complex128)
    for d in range(dim):
        u = np.eye(1, dtype=np.complex128)
        for i in range(wires):
            if i == index[0]:
                u = np.kron(u, np.outer(basis[d], basis[d]))
            elif i == index[1] and d in control_state:
                u = np.kron(u, M_exp)
            else:
                u = np.kron(u, np.eye(dim, dtype=np.complex128))
        U = U + u
    return U @ np.asarray(x).astype(np.complex128)


# ----------------------------- demo / check -----------------------------

if __name__ == "__main__":
    key = jax.random.PRNGKey(0)
    configs = [
        dict(dim=2, wires=2, index=(0, 1), control_state=(1,), batch=4),    # torch defaults
        dict(dim=3, wires=3, index=(2, 0), control_state=(1, 2), batch=8),  # qutrits, reversed wires
    ]

    for cfg in configs:
        key, kg, kr, ki = jax.random.split(key, 4)
        gate = CUGate(dim=cfg["dim"], wires=cfg["wires"], index=cfg["index"],
                      control_state=cfg["control_state"], key=kg)

        D = cfg["dim"] ** cfg["wires"]
        B = cfg["batch"]
        x = (jax.random.normal(kr, (D, B), dtype=jnp.float32)
             + 1j * jax.random.normal(ki, (D, B), dtype=jnp.float32)).astype(jnp.complex64)
        x = x / jnp.linalg.norm(x, axis=0, keepdims=True)

        y = jax.block_until_ready(gate(x))

        y_ref = reference_forward(gate.M, cfg["dim"], cfg["wires"], cfg["index"],
                                  cfg["control_state"], x)
        np.testing.assert_allclose(np.asarray(y), y_ref.astype(np.complex64),
                                   rtol=1e-4, atol=1e-4)

    print("KERNEL_OK")
</pallas_src>

<mosaic_0001>
module attributes {stable_mosaic.version = 11 : i64} {
  func.func @_cu_rows_kernel(%arg0: i32, %arg1: i32, %arg2: memref<2x2x2xf32, #tpu.memory_space<vmem>>, %arg3: memref<2x1x2x512xf32, #tpu.memory_space<vmem>>, %arg4: memref<2x1x2x512xf32, #tpu.memory_space<vmem>>) attributes {dimension_semantics = [#tpu.dimension_semantics<parallel>, #tpu.dimension_semantics<parallel>], iteration_bounds = array<i64: 1, 1>, scalar_prefetch = 0 : i64, scratch_operands = 0 : i64, tpu.core_type = #tpu.core_type<tc>, window_params = [{pipeline_mode = #tpu.pipeline_mode<synchronous>, transform_indices = @transform_0, window_bounds = array<i64: 2, 2, 2>}, {transform_indices = @transform_1, window_bounds = array<i64: 2, 1, 2, 512>}, {transform_indices = @transform_2, window_bounds = array<i64: 2, 1, 2, 512>}]} {
    %c0 = arith.constant 0 : index
    %c0_0 = arith.constant 0 : index
    %c0_1 = arith.constant 0 : index
    %0 = vector.load %arg2[%c0, %c0_0, %c0_1] : memref<2x2x2xf32, #tpu.memory_space<vmem>>, vector<1x2x2xf32>
    %1 = vector.shape_cast %0 : vector<1x2x2xf32> to vector<2x2xf32>
    %c1 = arith.constant 1 : index
    %c0_2 = arith.constant 0 : index
    %c0_3 = arith.constant 0 : index
    %2 = vector.load %arg2[%c1, %c0_2, %c0_3] : memref<2x2x2xf32, #tpu.memory_space<vmem>>, vector<1x2x2xf32>
    %3 = vector.shape_cast %2 : vector<1x2x2xf32> to vector<2x2xf32>
    %c0_i32 = arith.constant 0 : i32
    %c512_i32 = arith.constant 512 : i32
    %4 = arith.muli %c0_i32, %c512_i32 : i32
    %5 = tpu.assume_multiple %4, 512 : i32
    %c0_4 = arith.constant 0 : index
    %c0_5 = arith.constant 0 : index
    %c0_6 = arith.constant 0 : index
    %6 = arith.index_cast %5 : i32 to index
    %7 = vector.load %arg3[%c0_4, %c0_5, %c0_6, %6] : memref<2x1x2x512xf32, #tpu.memory_space<vmem>>, vector<1x1x2x512xf32>
    %8 = vector.shape_cast %7 : vector<1x1x2x512xf32> to vector<2x512xf32>
    %c1_7 = arith.constant 1 : index
    %c0_8 = arith.constant 0 : index
    %c0_9 = arith.constant 0 : index
    %9 = arith.index_cast %5 : i32 to index
    %10 = vector.load %arg3[%c1_7, %c0_8, %c0_9, %9] : memref<2x1x2x512xf32, #tpu.memory_space<vmem>>, vector<1x1x2x512xf32>
    %11 = vector.shape_cast %10 : vector<1x1x2x512xf32> to vector<2x512xf32>
    %cst = arith.constant 0.000000e+00 : f32
    %12 = vector.broadcast %cst : f32 to vector<2x512xf32>
    %cst_10 = arith.constant 0.000000e+00 : f32
    %13 = vector.broadcast %cst_10 : f32 to vector<2x512xf32>
    %14 = vector.extract_strided_slice %1 {offsets = [0, 0], sizes = [2, 1], strides = [1, 1]} : vector<2x2xf32> to vector<2x1xf32>
    %15 = vector.extract_strided_slice %3 {offsets = [0, 0], sizes = [2, 1], strides = [1, 1]} : vector<2x2xf32> to vector<2x1xf32>
    %16 = vector.extract_strided_slice %8 {offsets = [0, 0], sizes = [1, 512], strides = [1, 1]} : vector<2x512xf32> to vector<1x512xf32>
    %17 = vector.extract_strided_slice %11 {offsets = [0, 0], sizes = [1, 512], strides = [1, 1]} : vector<2x512xf32> to vector<1x512xf32>
    %18 = vector.broadcast %14 : vector<2x1xf32> to vector<2x512xf32>
    %19 = vector.broadcast %16 : vector<1x512xf32> to vector<2x512xf32>
    %20 = arith.mulf %18, %19 : vector<2x512xf32>
    %21 = arith.addf %12, %20 : vector<2x512xf32>
    %22 = vector.broadcast %15 : vector<2x1xf32> to vector<2x512xf32>
    %23 = vector.broadcast %17 : vector<1x512xf32> to vector<2x512xf32>
    %24 = arith.mulf %22, %23 : vector<2x512xf32>
    %25 = arith.subf %21, %24 : vector<2x512xf32>
    %26 = vector.broadcast %14 : vector<2x1xf32> to vector<2x512xf32>
    %27 = vector.broadcast %17 : vector<1x512xf32> to vector<2x512xf32>
    %28 = arith.mulf %26, %27 : vector<2x512xf32>
    %29 = arith.addf %13, %28 : vector<2x512xf32>
    %30 = vector.broadcast %15 : vector<2x1xf32> to vector<2x512xf32>
    %31 = vector.broadcast %16 : vector<1x512xf32> to vector<2x512xf32>
    %32 = arith.mulf %30, %31 : vector<2x512xf32>
    %33 = arith.addf %29, %32 : vector<2x512xf32>
    %34 = vector.extract_strided_slice %1 {offsets = [0, 1], sizes = [2, 1], strides = [1, 1]} : vector<2x2xf32> to vector<2x1xf32>
    %35 = vector.extract_strided_slice %3 {offsets = [0, 1], sizes = [2, 1], strides = [1, 1]} : vector<2x2xf32> to vector<2x1xf32>
    %36 = vector.extract_strided_slice %8 {offsets = [1, 0], sizes = [1, 512], strides = [1, 1]} : vector<2x512xf32> to vector<1x512xf32>
    %37 = vector.extract_strided_slice %11 {offsets = [1, 0], sizes = [1, 512], strides = [1, 1]} : vector<2x512xf32> to vector<1x512xf32>
    %38 = vector.broadcast %34 : vector<2x1xf32> to vector<2x512xf32>
    %39 = vector.broadcast %36 : vector<1x512xf32> to vector<2x512xf32>
    %40 = arith.mulf %38, %39 : vector<2x512xf32>
    %41 = arith.addf %25, %40 : vector<2x512xf32>
    %42 = vector.broadcast %35 : vector<2x1xf32> to vector<2x512xf32>
    %43 = vector.broadcast %37 : vector<1x512xf32> to vector<2x512xf32>
    %44 = arith.mulf %42, %43 : vector<2x512xf32>
    %45 = arith.subf %41, %44 : vector<2x512xf32>
    %46 = vector.broadcast %34 : vector<2x1xf32> to vector<2x512xf32>
    %47 = vector.broadcast %37 : vector<1x512xf32> to vector<2x512xf32>
    %48 = arith.mulf %46, %47 : vector<2x512xf32>
    %49 = arith.addf %33, %48 : vector<2x512xf32>
    %50 = vector.broadcast %35 : vector<2x1xf32> to vector<2x512xf32>
    %51 = vector.broadcast %36 : vector<1x512xf32> to vector<2x512xf32>
    %52 = arith.mulf %50, %51 : vector<2x512xf32>
    %53 = arith.addf %49, %52 : vector<2x512xf32>
    %c0_11 = arith.constant 0 : index
    %c0_12 = arith.constant 0 : index
    %c0_13 = arith.constant 0 : index
    %54 = arith.index_cast %5 : i32 to index
    %55 = vector.load %arg4[%c0_11, %c0_12, %c0_13, %54] : memref<2x1x2x512xf32, #tpu.memory_space<vmem>>, vector<1x1x2x512xf32>
    %56 = vector.shape_cast %55 : vector<1x1x2x512xf32> to vector<2x512xf32>
    %57 = vector.shape_cast %45 : vector<2x512xf32> to vector<1x1x2x512xf32>
    tpu.vector_store %arg4[%c0_11, %c0_12, %c0_13, %54], %57 {strides = array<i32>} : memref<2x1x2x512xf32, #tpu.memory_space<vmem>>, vector<1x1x2x512xf32>,
    %c1_14 = arith.constant 1 : index
    %c0_15 = arith.constant 0 : index
    %c0_16 = arith.constant 0 : index
    %58 = arith.index_cast %5 : i32 to index
    %59 = vector.load %arg4[%c1_14, %c0_15, %c0_16, %58] : memref<2x1x2x512xf32, #tpu.memory_space<vmem>>, vector<1x1x2x512xf32>
    %60 = vector.shape_cast %59 : vector<1x1x2x512xf32> to vector<2x512xf32>
    %61 = vector.shape_cast %53 : vector<2x512xf32> to vector<1x1x2x512xf32>
    tpu.vector_store %arg4[%c1_14, %c0_15, %c0_16, %58], %61 {strides = array<i32>} : memref<2x1x2x512xf32, #tpu.memory_space<vmem>>, vector<1x1x2x512xf32>,
    %c1_i32 = arith.constant 1 : i32
    return
  }
  func.func @transform_0(%arg0: i32, %arg1: i32) -> (i32, i32, i32) {
    %c0_i32 = arith.constant 0 : i32
    %c0_i32_0 = arith.constant 0 : i32
    %c0_i32_1 = arith.constant 0 : i32
    %c0_i32_2 = arith.constant 0 : i32
    return %c0_i32, %c0_i32_0, %c0_i32_1 : i32, i32, i32
  }
  func.func @transform_1(%arg0: i32, %arg1: i32) -> (i32, i32, i32, i32) {
    %c0_i32 = arith.constant 0 : i32
    %c0_i32_0 = arith.constant 0 : i32
    %c0_i32_1 = arith.constant 0 : i32
    return %c0_i32, %arg0, %c0_i32_0, %arg1 : i32, i32, i32, i32
  }
  func.func @transform_2(%arg0: i32, %arg1: i32) -> (i32, i32, i32, i32) {
    %c0_i32 = arith.constant 0 : i32
    %c0_i32_0 = arith.constant 0 : i32
    %c0_i32_1 = arith.constant 0 : i32
    return %c0_i32, %arg0, %c0_i32_0, %arg1 : i32, i32, i32, i32
  }
}

</mosaic_0001>

<bundles_post_ra>
// kernel: custom-call
= control target key start
LH: loop header
LB: loop body
LE: loop exit
PB: predicated region body
PF: predicated region fallthrough
CT: control target
= control target key end

     0   :  { %2 = vsyncpa [#allocation0], 0  ;;  %s61_s0 = inlined_call_operand.hbm [shape: c64[4,4], index: 0, kind: input, shape index: {}]   ;;  %s62_s1 = inlined_call_operand.vmem [shape: f32[4,4], index: 1, kind: output, shape index: {}]  }
   0x1   :  { %s3_s8 = sshll.u32 %s62_s1, 4  ;;  %s9_s11 = scalar_lea.hbm %s61_s0, 64  ;;  %s4_s8 = int_to_ptr.vmem [resolvable:$true] %s3_s8 }
   0x2   :  { %p10_p0 = scmp.ne.s32.totalorder %s61_s0, %s9_s11  ;;  %s11_s16 = scalar_lea.hbm %s61_s0, 128 }
   0x3   :  { %p12_p1 = scmp.lt.u32.totalorder %s11_s16, %s9_s11  ;;  %p13_p2 = scmp.lt.u32.totalorder %s9_s11, %s61_s0 }
   0x5   :  { %p14_p3 = por %p13_p2, %p12_p1 }
   0x7   :  { %p15_p4 = pnand %p14_p3, %p10_p0 }
   0x9   :  { %18 = shalt.err (!%p15_p4)  }
   0xa   :  { %s19_s1 = scalar_lea.vmem %s4_s8, 64  ;;  %p24_p6 = scmp.lt.s32.totalorder %s4_s8, %s4_s8 }
   0xb   :  { %p20_p5 = scmp.ne.s32.totalorder %s4_s8, %s19_s1  ;;  %p25_p7 = scmp.lt.s32.totalorder %s19_s1, %s19_s1 }
   0xd   :  { %p26_p8 = por %p25_p7, %p24_p6 }
   0xf   :  { %p27_p9 = pnand %p26_p8, %p20_p5 }
  0x11   :  { %30 = shalt.err (!%p27_p9)  }
  0x12   :  { %6 = dma.hbm_to_vmem [thread:$0]  %s61_s0, 64, %s4_s8, [#allocation0] }
  0x13   :  { %31 = dma.done.wait [#allocation0], 64  }
  0x14   :  { %32 = vsyncadd [#allocation0], 4294967232 }
  0x15   :  { %8 = vsyncpa [#allocation0], 1 }

// kernel: custom-call.1
= control target key start
LH: loop header
LB: loop body
LE: loop exit
PB: predicated region body
PF: predicated region fallthrough
CT: control target
= control target key end

     0   :  { %s59_s0 = inlined_call_operand.hbm [shape: c64[4,4], index: 0, kind: input, shape index: {}]   ;;  %s60_s1 = inlined_call_operand.vmem [shape: f32[4,4], index: 1, kind: output, shape index: {}]  }
   0x1   :  { %s2_s8 = scalar_lea.hbm %s59_s0, 64 }
   0x2   :  { %3 = vsyncpa [#allocation0], 0  ;;  %s4_s11 = sshll.u32 %s60_s1, 4  ;;  %s34_s14 = scalar_lea.hbm %s59_s0, 128  ;;  %s5_s11 = int_to_ptr.vmem [resolvable:$true] %s4_s11 }
   0x3   :  { %p11_p0 = scmp.ne.s32.totalorder %s2_s8, %s34_s14  ;;  %p13_p1 = scmp.lt.u32.totalorder %s2_s8, %s59_s0 }
   0x4   :  { %p14_p2 = scmp.lt.u32.totalorder %s34_s14, %s34_s14  ;;  %p16_p4 = scmp.lt.u32.totalorder %s34_s14, %s2_s8 }
   0x6   :  { %p15_p3 = por %p14_p2, %p13_p1 }
   0x8   :  { %p17_p5 = por %p16_p4, %p15_p3 }
   0xa   :  { %p18_p6 = pnand %p17_p5, %p11_p0 }
   0xc   :  { %21 = shalt.err (!%p18_p6)  }
   0xd   :  { %s22_s17 = scalar_lea.vmem %s5_s11, 64  ;;  %p27_p8 = scmp.lt.s32.totalorder %s5_s11, %s5_s11 }
   0xe   :  { %p23_p7 = scmp.ne.s32.totalorder %s5_s11, %s22_s17  ;;  %p28_p9 = scmp.lt.s32.totalorder %s22_s17, %s22_s17 }
  0x10   :  { %p29_p10 = por %p28_p9, %p27_p8 }
  0x12   :  { %p30_p11 = pnand %p29_p10, %p23_p7 }
  0x14   :  { %33 = shalt.err (!%p30_p11)  }
  0x15   :  { %7 = dma.hbm_to_vmem [thread:$0]  %s2_s8, 64, %s5_s11, [#allocation0] }
  0x16   :  { %35 = dma.done.wait [#allocation0], 64  }
  0x17   :  { %36 = vsyncadd [#allocation0], 4294967232 }
  0x18   :  { %9 = vsyncpa [#allocation0], 1 }

// kernel: custom-call.2
= control target key start
LH: loop header
LB: loop body
LE: loop exit
PB: predicated region body
PF: predicated region fallthrough
CT: control target
= control target key end

     0   :  { %s126_s0 = inlined_call_operand.vmem [shape: f32[4,4], index: 0, kind: input, shape index: {}]   ;;  %s127_s1 = inlined_call_operand.vmem [shape: f32[4,4], index: 1, kind: input, shape index: {}]   ;;  %s128_s2 = inlined_call_operand.hbm [shape: c64[4,4], index: 2, kind: output, shape index: {}]  }
   0x1   :  { %s87_s11 = scalar_lea.hbm %s128_s2, 64 }
   0x2   :  { %4 = vsyncpa [#allocation0], 0  ;;  %s5_s14 = sshll.u32 %s126_s0, 4  ;;  %s6_s14 = int_to_ptr.vmem [resolvable:$true] %s5_s14 }
   0x3   :  { %s18_s15 = scalar_lea.vmem %s6_s14, 64  ;;  %p23_p1 = scmp.lt.s32.totalorder %s6_s14, %s6_s14 }
   0x4   :  { %p19_p0 = scmp.ne.s32.totalorder %s6_s14, %s18_s15  ;;  %p24_p2 = scmp.lt.s32.totalorder %s18_s15, %s18_s15 }
   0x6   :  { %p25_p3 = por %p24_p2, %p23_p1 }
   0x8   :  { %p26_p4 = pnand %p25_p3, %p19_p0 }
   0xa   :  { %29 = shalt.err (!%p26_p4)  }
   0xb   :  { %p31_p5 = scmp.ne.s32.totalorder %s128_s2, %s87_s11  ;;  %s32_s0 = scalar_lea.hbm %s128_s2, 128 }
   0xc   :  { %p33_p6 = scmp.lt.u32.totalorder %s32_s0, %s87_s11  ;;  %p34_p7 = scmp.lt.u32.totalorder %s87_s11, %s128_s2 }
   0xe   :  { %p35_p8 = por %p34_p7, %p33_p6 }
  0x10   :  { %p36_p9 = pnand %p35_p8, %p31_p5 }
  0x12   :  { %39 = shalt.err (!%p36_p9)  }
  0x13   :  { %8 = dma.vmem_to_hbm [thread:$0]  %s6_s14, 64, %s128_s2, [#allocation0] }
  0x14   :  { %65 = dma.done.wait [#allocation0], 64  }
  0x15   :  { %66 = vsyncadd [#allocation0], 4294967232 }
  0x16   :  { %10 = vsyncpa [#allocation0], 1 }
  0x17   :  { %11 = vsyncpa [#allocation1], 0  ;;  %s12_s28 = sshll.u32 %s127_s1, 4  ;;  %s13_s28 = int_to_ptr.vmem [resolvable:$true] %s12_s28 }
  0x18   :  { %s40_s29 = scalar_lea.vmem %s13_s28, 64  ;;  %p45_p11 = scmp.lt.s32.totalorder %s13_s28, %s13_s28 }
  0x19   :  { %p41_p10 = scmp.ne.s32.totalorder %s13_s28, %s40_s29  ;;  %p46_p12 = scmp.lt.s32.totalorder %s40_s29, %s40_s29 }
  0x1b   :  { %p47_p13 = por %p46_p12, %p45_p11 }
  0x1d   :  { %p48_p0 = pnand %p47_p13, %p41_p10 }
  0x1f   :  { %51 = shalt.err (!%p48_p0)  }
  0x20   :  { %p53_p1 = scmp.ne.s32.totalorder %s87_s11, %s32_s0  ;;  %p56_p2 = scmp.lt.u32.totalorder %s32_s0, %s32_s0 }
  0x22   :  { %p57_p3 = por %p56_p2, %p34_p7 }
  0x24   :  { %p59_p4 = por %p57_p3, %p33_p6 }
  0x26   :  { %p60_p5 = pnand %p59_p4, %p53_p1 }
  0x28   :  { %63 = shalt.err (!%p60_p5)  }
  0x29   :  { %15 = dma.vmem_to_hbm [thread:$0]  %s13_s28, 64, %s87_s11, [#allocation1] }
  0x2a   :  { %67 = dma.done.wait [#allocation1], 64  }
  0x2b   :  { %68 = vsyncadd [#allocation1], 4294967232 }
  0x2c   :  { %17 = vsyncpa [#allocation1], 1 }

// kernel: _cu_apply.1
= control target key start
LH: loop header
LB: loop body
LE: loop exit
PB: predicated region body
PF: predicated region fallthrough
CT: control target
= control target key end

     0   :  { %v310_v0 = vmov 1   ;;  %v311_v1 = vmov 0   ;;  %v25_v4 = vlaneseq  ;;  %v312_v18 = vmov 1983009808   ;;  %s352_s0 = inlined_call_operand.vmem [shape: f32[2,2,2], index: 0, kind: input, shape index: {}]   ;;  %s353_s1 = inlined_call_operand.vmem [shape: f32[2,1,2,512], index: 1, kind: input, shape index: {}]   ;;  %s354_s2 = inlined_call_operand.vmem [shape: f32[2,1,2,512], index: 2, kind: output, shape index: {}]  }
   0x1   :  { %308 = vset.pattern.permute.xlu1 %v310_v0  ;;  %307 = vset.pattern.permute.xlu0 %v311_v1  ;;  %v11_v2 = vld [vmem:[%s352_s0] sm:$0x3]  ;;  %v301_v3 = vld [vmem:[%s352_s0 + $0x2] sm:$0x3]  ;;  %v302_v16 = vld [vmem:[%s353_s1 + $0x8] sm:$0xff]  ;;  %v254_v19 = vunpack.c.l.s4 %v312_v18 }
   0x2   :  { %136 = vperm.xlu1 %308, %v11_v2   ;;  %21 = vperm.xlu0 %307, %v11_v2   ;;  %v26_v5 = vshrl.u32 %v25_v4, 7  ;;  %v14_v8 = vld [vmem:[%s353_s1] sm:$0xff] }
   0x3   :  { %v255_v35 = vunpack.c.0.s8 %v254_v19 }
   0x4   :  { %v141_v6 = vsub.s32 1, %v26_v5  ;;  %v145_v7 = vsub.s32 3, %v26_v5  ;;  %v149_v9 = vsub.s32 5, %v26_v5  ;;  %v153_v10 = vsub.s32 7, %v26_v5 }
   0x5   :  { %v27_v12 = vsub.s32 0, %v26_v5  ;;  %v31_v13 = vsub.s32 2, %v26_v5  ;;  %v35_v14 = vsub.s32 4, %v26_v5  ;;  %v39_v15 = vsub.s32 6, %v26_v5 }
   0x6   :  { %184 = vperm.xlu1 %308, %v301_v3   ;;  %71 = vperm.xlu0 %307, %v301_v3   ;;  %v142_v11 = vrot.slane %v14_v8, %v141_v6  ;;  %v146_v17 = vrot.slane %v14_v8, %v145_v7  ;;  %v150_v20 = vrot.slane %v14_v8, %v149_v9 }
   0x7   :  { %v154_v21 = vrot.slane %v14_v8, %v153_v10  ;;  %v190_v22 = vrot.slane %v302_v16, %v141_v6  ;;  %v194_v23 = vrot.slane %v302_v16, %v145_v7  ;;  %v198_v25 = vrot.slane %v302_v16, %v149_v9 }
   0x8   :  { %v162_v24 = vrot.slane %v142_v11, %v141_v6  ;;  %v202_v26 = vrot.slane %v302_v16, %v153_v10  ;;  %v28_v27 = vrot.slane %v14_v8, %v27_v12  ;;  %v32_v28 = vrot.slane %v14_v8, %v31_v13 }
   0x9   :  { %v36_v29 = vrot.slane %v14_v8, %v35_v14  ;;  %v40_v30 = vrot.slane %v14_v8, %v39_v15  ;;  %v78_v31 = vrot.slane %v302_v16, %v27_v12  ;;  %v82_v32 = vrot.slane %v302_v16, %v31_v13 }
   0xa   :  { %309 = vset.pattern.permute.xlu0 %v310_v0  ;;  %v86_v33 = vrot.slane %v302_v16, %v35_v14  ;;  %v90_v34 = vrot.slane %v302_v16, %v39_v15  ;;  %v166_v36 = vrot.slane %v146_v17, %v141_v6  ;;  %v170_v37 = vrot.slane %v150_v20, %v141_v6 }
   0xb   :  { %v174_v38 = vrot.slane %v154_v21, %v141_v6  ;;  %v210_v39 = vrot.slane %v190_v22, %v141_v6  ;;  %v214_v40 = vrot.slane %v194_v23, %v141_v6  ;;  %v218_v41 = vrot.slane %v198_v25, %v141_v6 }
   0xc   :  { %v222_v42 = vrot.slane %v202_v26, %v141_v6  ;;  %v48_v43 = vrot.slane %v28_v27, %v27_v12  ;;  %v52_v44 = vrot.slane %v32_v28, %v27_v12  ;;  %v56_v45 = vrot.slane %v36_v29, %v27_v12 }
   0xd   :  { %v60_v46 = vrot.slane %v40_v30, %v27_v12  ;;  %v98_v47 = vrot.slane %v78_v31, %v27_v12  ;;  %v102_v50 = vrot.slane %v82_v32, %v27_v12  ;;  %v106_v51 = vrot.slane %v86_v33, %v27_v12 }
   0xe   :  { %v110_v52 = vrot.slane %v90_v34, %v27_v12  ;;  %v340_v53 = vsub.s32 %v255_v35, %v26_v5 }
  0x81   :  { %v137_v48 = vpop.permute.xlu1 %136  ;;  %v22_v49 = vpop.permute.xlu0 %21 }
  0x82   :  { %v175_v54 = vmul.f32 %v162_v24, %v137_v48  ;;  %v176_v55 = vmul.f32 %v166_v36, %v137_v48  ;;  %v177_v56 = vmul.f32 %v170_v37, %v137_v48  ;;  %v178_v57 = vmul.f32 %v174_v38, %v137_v48 }
  0x83   :  { %v231_v58 = vmul.f32 %v210_v39, %v137_v48  ;;  %v232_v59 = vmul.f32 %v214_v40, %v137_v48  ;;  %v233_v60 = vmul.f32 %v218_v41, %v137_v48  ;;  %v234_v61 = vmul.f32 %v222_v42, %v137_v48 }
  0x84   :  { %v61_v62 = vmul.f32 %v48_v43, %v22_v49  ;;  %v62_v63 = vmul.f32 %v52_v44, %v22_v49  ;;  %v63_v0 = vmul.f32 %v56_v45, %v22_v49  ;;  %v64_v1 = vmul.f32 %v60_v46, %v22_v49 }
  0x85   :  { %v185_v2 = vpop.permute.xlu1 %184  ;;  %v119_v3 = vmul.f32 %v98_v47, %v22_v49  ;;  %v120_v4 = vmul.f32 %v102_v50, %v22_v49  ;;  %v121_v6 = vmul.f32 %v106_v51, %v22_v49  ;;  %v122_v7 = vmul.f32 %v110_v52, %v22_v49  ;;  %v72_v8 = vpop.permute.xlu0 %71 }
  0x86   :  { %v223_v5 = vmul.f32 %v210_v39, %v185_v2  ;;  %v224_v9 = vmul.f32 %v214_v40, %v185_v2  ;;  %v225_v10 = vmul.f32 %v218_v41, %v185_v2  ;;  %v226_v11 = vmul.f32 %v222_v42, %v185_v2 }
  0x87   :  { %v239_v12 = vmul.f32 %v185_v2, %v162_v24  ;;  %v240_v13 = vmul.f32 %v185_v2, %v166_v36  ;;  %v241_v14 = vmul.f32 %v185_v2, %v170_v37  ;;  %v242_v15 = vmul.f32 %v185_v2, %v174_v38 }
  0x88   :  { %v111_v16 = vmul.f32 %v98_v47, %v72_v8  ;;  %v112_v17 = vmul.f32 %v102_v50, %v72_v8  ;;  %v113_v18 = vmul.f32 %v106_v51, %v72_v8  ;;  %v114_v19 = vmul.f32 %v110_v52, %v72_v8 }
  0x89   :  { %v127_v20 = vmul.f32 %v72_v8, %v48_v43  ;;  %v128_v21 = vmul.f32 %v72_v8, %v52_v44  ;;  %v129_v22 = vmul.f32 %v72_v8, %v56_v45  ;;  %v130_v23 = vmul.f32 %v72_v8, %v60_v46 }
  0x8a   :  { %v115_v25 = vsub.f32 %v61_v62, %v111_v16  ;;  %v116_v26 = vsub.f32 %v62_v63, %v112_v17  ;;  %v117_v27 = vsub.f32 %v63_v0, %v113_v18  ;;  %v118_v28 = vsub.f32 %v64_v1, %v114_v19 }
  0x8b   :  { %v131_v29 = vadd.f32 %v127_v20, %v119_v3  ;;  %v132_v30 = vadd.f32 %v128_v21, %v120_v4  ;;  %v133_v31 = vadd.f32 %v129_v22, %v121_v6  ;;  %v134_v32 = vadd.f32 %v130_v23, %v122_v7 }
  0x8c   :  { %v179_v24 = vadd.f32 %v175_v54, %v115_v25  ;;  %v180_v33 = vadd.f32 %v176_v55, %v116_v26  ;;  %v181_v34 = vadd.f32 %v177_v56, %v117_v27  ;;  %v182_v35 = vadd.f32 %v178_v57, %v118_v28 }
  0x8d   :  { %v235_v36 = vadd.f32 %v231_v58, %v131_v29  ;;  %v236_v37 = vadd.f32 %v232_v59, %v132_v30  ;;  %v237_v38 = vadd.f32 %v233_v60, %v133_v31  ;;  %v238_v39 = vadd.f32 %v234_v61, %v134_v32 }
  0x8e   :  { %v227_v40 = vsub.f32 %v179_v24, %v223_v5  ;;  %v228_v41 = vsub.f32 %v180_v33, %v224_v9  ;;  %v229_v42 = vsub.f32 %v181_v34, %v225_v10  ;;  %v230_v43 = vsub.f32 %v182_v35, %v226_v11 }
  0x8f   :  { %v243_v44 = vadd.f32 %v239_v12, %v235_v36  ;;  %v244_v45 = vadd.f32 %v240_v13, %v236_v37  ;;  %v245_v46 = vadd.f32 %v241_v14, %v237_v38  ;;  %v246_v47 = vadd.f32 %v242_v15, %v238_v39 }
  0x90   :  { %v251_v48 = vcombine.low %v227_v40, %v228_v41  ;;  %v252_v49 = vcombine.low %v229_v42, %v230_v43 }
  0x91   :  { %v274_v50 = vcombine.low %v243_v44, %v244_v45  ;;  %v275_v51 = vcombine.low %v245_v46, %v246_v47 }
  0x92   :  { %v259_v52 = vrot.slane %v251_v48, %v340_v53  ;;  %v266_v54 = vrot.slane %v252_v49, %v340_v53 }
  0x93   :  { %v282_v55 = vrot.slane %v274_v50, %v340_v53  ;;  %v289_v56 = vrot.slane %v275_v51, %v340_v53 }
  0x94   :  { %v267_v57 = vcombine.low %v259_v52, %v266_v54 }
  0x95   :  { %v290_v58 = vcombine.low %v282_v55, %v289_v56 }
  0x96   :  { %269 = vst [vmem:[%s354_s2] sm:$0xff] %v267_v57 }
  0x97   :  { %303 = vst [vmem:[%s354_s2 + $0x8] sm:$0xff] %v290_v58 }

</bundles_post_ra>
